<compile_context>
chip_gen: v5e
topology: v5e:2x2
jax: 0.10.0
libtpu: 0.0.40
codegen_flags: <defaults>
</compile_context>

<pallas_src>
import functools

import jax
import jax.numpy as jnp
from jax.experimental import pallas as pl
from jax.experimental.pallas import tpu as pltpu


def _rope_kernel(x_ref, cos_ref, sina_ref, sinb_ref, o_ref, *,
                 d2: int, hd: int, seq_tile: int, resident_tables: bool):
    # x_ref / o_ref: (seq_tile, B, HD)
    # cos/sina/sinb: (S, 1, HD) if resident, else (seq_tile, 1, HD)
    if resident_tables:
        row0 = pl.multiple_of(pl.program_id(0) * seq_tile, seq_tile)
        cos = cos_ref[pl.ds(row0, seq_tile)]      # (seq_tile, 1, HD)
        sin_a = sina_ref[pl.ds(row0, seq_tile)]
        sin_b = sinb_ref[pl.ds(row0, seq_tile)]
    else:
        cos = cos_ref[...]
        sin_a = sina_ref[...]
        sin_b = sinb_ref[...]

    x = x_ref[...].astype(jnp.float32)            # (seq_tile, B, HD)

    # Partner values via XLU lane rotations (free slot for this kernel):
    #   x_plus[..., j]  = x[..., j + d2]   (used in the first half of each head)
    #   x_minus[..., j] = x[..., j - d2]   (used in the second half)
    x_plus = pltpu.roll(x, shift=hd - d2, axis=2)
    x_minus = pltpu.roll(x, shift=d2, axis=2)

    # Pure FMA over the full lane-dense tile (pass-through cols: cos=1, sin=0).
    out = x * cos + x_plus * sin_a + x_minus * sin_b
    o_ref[...] = out.astype(o_ref.dtype)


def _pick_seq_tile(seq_len: int, row_bytes: int,
                   target_bytes: int = 2 * 1024 * 1024) -> int:
    """Largest divisor of seq_len (preferring multiples of 8) with block ~<= target."""
    max_rows = max(1, target_bytes // max(row_bytes, 1))
    best, best8 = 1, None
    for t in range(1, seq_len + 1):
        if seq_len % t or t > max_rows:
            continue
        best = t
        if t % 8 == 0:
            best8 = t
    return best8 if best8 is not None else best


def rotary_positional_embeddings(x: jax.Array, d: int, base: int = 10000,
                                 seq_tile: int | None = None) -> jax.Array:
    """Applies RoPE to the first `d` features of x.  x: [seq_len, batch, heads, head_dim]."""
    S, B, H, D = x.shape
    assert d % 2 == 0 and 0 < d <= D
    HD = H * D
    d2 = d // 2

    # --- build cos/sin caches (plain JAX glue, mirrors torch _build_cache) ----
    theta = 1.0 / (base ** (jnp.arange(0, d, 2, dtype=jnp.float32) / d))   # (d/2,)
    seq_idx = jnp.arange(S, dtype=jnp.float32)                             # (S,)
    idx_theta = seq_idx[:, None] * theta[None, :]                          # (S, d/2)
    idx_theta2 = jnp.concatenate([idx_theta, idx_theta], axis=1)           # (S, d)
    cos_d = jnp.cos(idx_theta2)                                            # (S, d)
    sin_d = jnp.sin(idx_theta2)                                            # (S, d)

    # Expand to lane-dense per-head width D (pass-through cols: cos=1, sin=0),
    # bake the neg_half sign into the sin tables, then tile across H heads.
    ones_pass = jnp.ones((S, D - d), jnp.float32)
    zeros_pass = jnp.zeros((S, D - d), jnp.float32)
    zeros_half = jnp.zeros((S, d2), jnp.float32)
    cos_head = jnp.concatenate([cos_d, ones_pass], axis=1)                          # (S, D)
    sina_head = jnp.concatenate([-sin_d[:, :d2], zeros_half, zeros_pass], axis=1)   # (S, D)
    sinb_head = jnp.concatenate([zeros_half, sin_d[:, d2:], zeros_pass], axis=1)    # (S, D)
    cos_full = jnp.tile(cos_head, (1, H)).reshape(S, 1, HD)
    sina_full = jnp.tile(sina_head, (1, H)).reshape(S, 1, HD)
    sinb_full = jnp.tile(sinb_head, (1, H)).reshape(S, 1, HD)

    # --- lane-dense reshape (free, no data movement) ---------------------------
    x_flat = x.reshape(S, B, HD)
    row_bytes = B * HD * x.dtype.itemsize
    if seq_tile is None:
        seq_tile = _pick_seq_tile(S, row_bytes)
    assert S % seq_tile == 0, "seq_len must be divisible by seq_tile"
    grid = (S // seq_tile,)

    # Keep the small cos/sin tables fully VMEM-resident (single DMA); fall back
    # to per-tile pipelining if the full tables would be large.
    table_bytes = 3 * S * HD * 4
    resident_tables = table_bytes <= 4 * 1024 * 1024
    if resident_tables:
        table_spec = pl.BlockSpec((S, 1, HD), lambda i: (0, 0, 0))
    else:
        table_spec = pl.BlockSpec((seq_tile, 1, HD), lambda i: (i, 0, 0))

    kernel = functools.partial(_rope_kernel, d2=d2, hd=HD, seq_tile=seq_tile,
                               resident_tables=resident_tables)

    out_flat = pl.pallas_call(
        kernel,
        out_shape=jax.ShapeDtypeStruct((S, B, HD), x.dtype),
        grid_spec=pltpu.PrefetchScalarGridSpec(
            num_scalar_prefetch=0,
            grid=grid,
            in_specs=[
                pl.BlockSpec((seq_tile, B, HD), lambda i: (i, 0, 0)),
                table_spec,
                table_spec,
                table_spec,
            ],
            out_specs=pl.BlockSpec((seq_tile, B, HD), lambda i: (i, 0, 0)),
        ),
        compiler_params=pltpu.CompilerParams(
            dimension_semantics=("parallel",),
            vmem_limit_bytes=32 * 1024 * 1024,
        ),
    )(x_flat, cos_full, sina_full, sinb_full)

    return out_flat.reshape(S, B, H, D)


def _rope_reference(x, d, base=10000):
    """Pure-JAX reference mirroring the PyTorch module exactly."""
    S = x.shape[0]
    theta = 1.0 / (base ** (jnp.arange(0, d, 2, dtype=jnp.float32) / d))
    seq_idx = jnp.arange(S, dtype=jnp.float32)
    idx_theta = jnp.einsum("n,d->nd", seq_idx, theta)
    idx_theta2 = jnp.concatenate([idx_theta, idx_theta], axis=1)
    cos_c = jnp.cos(idx_theta2)[:, None, None, :]
    sin_c = jnp.sin(idx_theta2)[:, None, None, :]
    x_rope, x_pass = x[..., :d], x[..., d:]
    d2 = d // 2
    neg_half = jnp.concatenate([-x_rope[..., d2:], x_rope[..., :d2]], axis=-1)
    x_rope = x_rope * cos_c + neg_half * sin_c
    return jnp.concatenate([x_rope, x_pass], axis=-1)


if __name__ == "__main__":
    # x: [seq_len=16, batch=2, n_heads=4, head_dim=32], rotate first d=16 features.
    key = jax.random.PRNGKey(0)
    S, B, H, D = 16, 2, 4, 32
    d = 16
    x = jax.random.normal(key, (S, B, H, D), dtype=jnp.float32)

    out = rotary_positional_embeddings(x, d=d, base=10000)
    out = jax.block_until_ready(out)

    ref = _rope_reference(x, d=d)
    assert out.shape == x.shape and out.dtype == x.dtype
    assert jnp.allclose(out, ref, atol=1e-5, rtol=1e-5), "mismatch vs reference"

    print("KERNEL_OK")
</pallas_src>

<mosaic_0001>
module attributes {stable_mosaic.version = 11 : i64} {
  func.func @_rope_kernel(%arg0: i32, %arg1: memref<16x2x128xf32, #tpu.memory_space<vmem>>, %arg2: memref<16x1x128xf32, #tpu.memory_space<vmem>>, %arg3: memref<16x1x128xf32, #tpu.memory_space<vmem>>, %arg4: memref<16x1x128xf32, #tpu.memory_space<vmem>>, %arg5: memref<16x2x128xf32, #tpu.memory_space<vmem>>) attributes {dimension_semantics = [#tpu.dimension_semantics<parallel>], iteration_bounds = array<i64: 1>, scalar_prefetch = 0 : i64, scratch_operands = 0 : i64, tpu.core_type = #tpu.core_type<tc>, window_params = [{transform_indices = @transform_0, window_bounds = array<i64: 16, 2, 128>}, {pipeline_mode = #tpu.pipeline_mode<synchronous>, transform_indices = @transform_1, window_bounds = array<i64: 16, 1, 128>}, {pipeline_mode = #tpu.pipeline_mode<synchronous>, transform_indices = @transform_2, window_bounds = array<i64: 16, 1, 128>}, {pipeline_mode = #tpu.pipeline_mode<synchronous>, transform_indices = @transform_3, window_bounds = array<i64: 16, 1, 128>}, {transform_indices = @transform_4, window_bounds = array<i64: 16, 2, 128>}]} {
    %c16_i32 = arith.constant 16 : i32
    %0 = arith.muli %arg0, %c16_i32 : i32
    %1 = tpu.assume_multiple %0, 16 : i32
    %2 = arith.index_cast %1 : i32 to index
    %c0 = arith.constant 0 : index
    %c0_0 = arith.constant 0 : index
    %3 = vector.load %arg2[%2, %c0, %c0_0] : memref<16x1x128xf32, #tpu.memory_space<vmem>>, vector<16x1x128xf32>
    %4 = arith.index_cast %1 : i32 to index
    %c0_1 = arith.constant 0 : index
    %c0_2 = arith.constant 0 : index
    %5 = vector.load %arg3[%4, %c0_1, %c0_2] : memref<16x1x128xf32, #tpu.memory_space<vmem>>, vector<16x1x128xf32>
    %6 = arith.index_cast %1 : i32 to index
    %c0_3 = arith.constant 0 : index
    %c0_4 = arith.constant 0 : index
    %7 = vector.load %arg4[%6, %c0_3, %c0_4] : memref<16x1x128xf32, #tpu.memory_space<vmem>>, vector<16x1x128xf32>
    %c0_5 = arith.constant 0 : index
    %c0_6 = arith.constant 0 : index
    %c0_7 = arith.constant 0 : index
    %8 = vector.load %arg1[%c0_5, %c0_6, %c0_7] : memref<16x2x128xf32, #tpu.memory_space<vmem>>, vector<16x2x128xf32>
    %c120_i32 = arith.constant 120 : i32
    %9 = tpu.dynamic_rotate %8 by %c120_i32 dim 2 : vector<16x2x128xf32>, i32 -> vector<16x2x128xf32>
    %c8_i32 = arith.constant 8 : i32
    %10 = tpu.dynamic_rotate %8 by %c8_i32 dim 2 : vector<16x2x128xf32>, i32 -> vector<16x2x128xf32>
    %11 = vector.broadcast %3 : vector<16x1x128xf32> to vector<16x2x128xf32>
    %12 = arith.mulf %8, %11 : vector<16x2x128xf32>
    %13 = vector.broadcast %5 : vector<16x1x128xf32> to vector<16x2x128xf32>
    %14 = arith.mulf %9, %13 : vector<16x2x128xf32>
    %15 = arith.addf %12, %14 : vector<16x2x128xf32>
    %16 = vector.broadcast %7 : vector<16x1x128xf32> to vector<16x2x128xf32>
    %17 = arith.mulf %10, %16 : vector<16x2x128xf32>
    %18 = arith.addf %15, %17 : vector<16x2x128xf32>
    %c0_8 = arith.constant 0 : index
    %c0_9 = arith.constant 0 : index
    %c0_10 = arith.constant 0 : index
    %19 = vector.load %arg5[%c0_8, %c0_9, %c0_10] : memref<16x2x128xf32, #tpu.memory_space<vmem>>, vector<16x2x128xf32>
    tpu.vector_store %arg5[%c0_8, %c0_9, %c0_10], %18 {strides = array<i32>} : memref<16x2x128xf32, #tpu.memory_space<vmem>>, vector<16x2x128xf32>,
    return
  }
  func.func @transform_0(%arg0: i32) -> (i32, i32, i32) {
    %c0_i32 = arith.constant 0 : i32
    %c0_i32_0 = arith.constant 0 : i32
    %c0_i32_1 = arith.constant 0 : i32
    return %arg0, %c0_i32, %c0_i32_0 : i32, i32, i32
  }
  func.func @transform_1(%arg0: i32) -> (i32, i32, i32) {
    %c0_i32 = arith.constant 0 : i32
    %c0_i32_0 = arith.constant 0 : i32
    %c0_i32_1 = arith.constant 0 : i32
    %c0_i32_2 = arith.constant 0 : i32
    return %c0_i32, %c0_i32_0, %c0_i32_1 : i32, i32, i32
  }
  func.func @transform_2(%arg0: i32) -> (i32, i32, i32) {
    %c0_i32 = arith.constant 0 : i32
    %c0_i32_0 = arith.constant 0 : i32
    %c0_i32_1 = arith.constant 0 : i32
    %c0_i32_2 = arith.constant 0 : i32
    return %c0_i32, %c0_i32_0, %c0_i32_1 : i32, i32, i32
  }
  func.func @transform_3(%arg0: i32) -> (i32, i32, i32) {
    %c0_i32 = arith.constant 0 : i32
    %c0_i32_0 = arith.constant 0 : i32
    %c0_i32_1 = arith.constant 0 : i32
    %c0_i32_2 = arith.constant 0 : i32
    return %c0_i32, %c0_i32_0, %c0_i32_1 : i32, i32, i32
  }
  func.func @transform_4(%arg0: i32) -> (i32, i32, i32) {
    %c0_i32 = arith.constant 0 : i32
    %c0_i32_0 = arith.constant 0 : i32
    %c0_i32_1 = arith.constant 0 : i32
    return %arg0, %c0_i32, %c0_i32_0 : i32, i32, i32
  }
}

</mosaic_0001>

<bundles_post_ra>
// kernel: tpu_custom_call.1
= control target key start
LH: loop header
LB: loop body
LE: loop exit
PB: predicated region body
PF: predicated region fallthrough
CT: control target
= control target key end

     0   :  { %9 = vsyncpa [#allocation3], 0  ;;  %s829_s0 = inlined_call_operand.hbm [shape: f32[16,2,128], index: 0, kind: input, shape index: {}]   ;;  %s830_s1 = inlined_call_operand.hbm [shape: f32[16,1,128], index: 1, kind: input, shape index: {}]   ;;  %s831_s2 = inlined_call_operand.hbm [shape: f32[16,1,128], index: 2, kind: input, shape index: {}]   ;;  %s832_s3 = inlined_call_operand.hbm [shape: f32[16,1,128], index: 3, kind: input, shape index: {}]   ;;  %s833_s4 = inlined_call_operand.hbm [shape: f32[16,2,128], index: 4, kind: output, shape index: {}]  }
   0x1   :  { %10 = vsyncpa [#allocation6], 0 }
   0x2   :  { %11 = vsyncpa [#allocation9], 0  ;;  %s30_s17 = sshll.u32 %s830_s1, 4  ;;  %s31_s17 = int_to_ptr.hbm [resolvable:$true] %s30_s17 }
   0x3   :  { %12 = vsyncpa [#allocation4], 0  ;;  %s661_s18 = smov [#allocation5]   ;;  %s17_s22 = sshll.u32 %s829_s0, 4  ;;  %s18_s22 = int_to_ptr.hbm [resolvable:$true] %s17_s22 }
   0x4   :  { %s32_s19 = sshll.u32 %s661_s18, 4  ;;  %s662_s23 = smov 16   ;;  %s33_s19 = int_to_ptr.vmem [resolvable:$true] %s32_s19 }
   0x5   :  { %s663_s24 = smov 1   ;;  %s664_s25 = smov [#allocation2]  }
   0x6   :  { %38 = dma.hbm_to_vmem [thread:$0]  %s31_s17, 256, %s33_s19, [#allocation6], %s662_s23, %s662_s23, %s663_s24  }
   0x7   :  { %s19_s26 = sshll.u32 %s664_s25, 4  ;;  %s665_s27 = smov 32   ;;  %s20_s26 = int_to_ptr.vmem [resolvable:$true] %s19_s26 }
   0x8   :  { %s666_s28 = smov 2   ;;  %s43_s30 = sshll.u32 %s831_s2, 4  ;;  %s44_s30 = int_to_ptr.hbm [resolvable:$true] %s43_s30 }
   0x9   :  { %25 = dma.hbm_to_vmem [thread:$0]  %s18_s22, 512, %s20_s26, [#allocation3], %s665_s27, %s665_s27, %s666_s28  }
   0xa   :  { %s667_s5 = smov [#allocation7]   ;;  %s56_s8 = sshll.u32 %s832_s3, 4  ;;  %s57_s8 = int_to_ptr.hbm [resolvable:$true] %s56_s8 }
   0xb   :  { %s45_s0 = sshll.u32 %s667_s5, 4  ;;  %s668_s9 = smov [#allocation8]   ;;  %s46_s0 = int_to_ptr.vmem [resolvable:$true] %s45_s0 }
   0xc   :  { %51 = dma.hbm_to_vmem [thread:$0]  %s44_s30, 256, %s46_s0, [#allocation6], %s662_s23, %s662_s23, %s663_s24  }
   0xd   :  { %s58_s10 = sshll.u32 %s668_s9, 4  ;;  %s59_s10 = int_to_ptr.vmem [resolvable:$true] %s58_s10 }
   0xe   :  { %64 = dma.hbm_to_vmem [thread:$0]  %s57_s8, 256, %s59_s10, [#allocation9], %s662_s23, %s662_s23, %s663_s24  }
   0xf   :  { %653 = dma.done.wait [#allocation3], 512  }
  0x10   :  { %654 = vsyncadd [#allocation3], 4294966784 }
  0x11   :  { %655 = dma.done.wait [#allocation6], 512  }
  0x12   :  { %656 = vsyncadd [#allocation6], 4294966784 }
  0x13   :  { %657 = dma.done.wait [#allocation9], 256  }
  0x14   :  { %658 = vsyncadd [#allocation9], 4294967040  ;;  %v712_v0 = vld [vmem:[#allocation2 + $0x8] sm:$0x3]  ;;  %s669_s2 = smov 120   ;;  %s670_s3 = smov 8  }
  0x15   :  { %157 = vrot.lane.b32.xlu2 %v712_v0, %s669_s2  ;;  %v716_v1 = vld [vmem:[#allocation2 + $0x4] sm:$0x3]  ;;  %v720_v2 = vld [vmem:[#allocation2] sm:$0x3]  ;;  %v138_v3 = vld [vmem:[#allocation2 + $0xa] sm:$0x3] }
  0x16   :  { %153 = vrot.lane.b32.xlu1 %v716_v1, %s669_s2  ;;  %149 = vrot.lane.b32.xlu0 %v720_v2, %s669_s2  ;;  %v724_v4 = vld [vmem:[#allocation2 + $0x6] sm:$0x3]  ;;  %v726_v5 = vld [vmem:[#allocation2 + $0x2] sm:$0x3]  ;;  %v141_v6 = vld [vmem:[#allocation2 + $0x10] sm:$0x3] }
  0x17   :  { %v733_v7 = vld [vmem:[#allocation2 + $0xe] sm:$0x3]  ;;  %v735_v8 = vld [vmem:[#allocation2 + $0xc] sm:$0x3]  ;;  %v144_v9 = vld [vmem:[#allocation2 + $0x16] sm:$0x3] }
  0x18   :  { %v742_v10 = vld [vmem:[#allocation2 + $0x14] sm:$0x3]  ;;  %v744_v11 = vld [vmem:[#allocation2 + $0x12] sm:$0x3]  ;;  %v751_v12 = vld [vmem:[#allocation2 + $0x1c] sm:$0x3] }
  0x19   :  { %v753_v13 = vld [vmem:[#allocation2 + $0x1a] sm:$0x3]  ;;  %v755_v14 = vld [vmem:[#allocation2 + $0x18] sm:$0x3]  ;;  %v763_v15 = vld [vmem:[#allocation2 + $0x1e] sm:$0x3] }
  0x1a   :  { %v488_v17 = vld [vmem:[#allocation5 + $0x5] ss:$0 sm:$0xff]  ;;  %v502_v18 = vld [vmem:[#allocation7 + $0x5] ss:$0 sm:$0xff]  ;;  %v491_v22 = vld [vmem:[#allocation5 + $0x8] ss:$0 sm:$0xff] }
  0x1b   :  { %v266_v19 = vmul.f32 %v488_v17, %v138_v3  ;;  %v503_v24 = vld [vmem:[#allocation7 + $0x8] ss:$0 sm:$0xff]  ;;  %v269_v25 = vmul.f32 %v491_v22, %v141_v6  ;;  %v494_v28 = vld [vmem:[#allocation5 + $0xb] ss:$0 sm:$0xff]  ;;  %v504_v30 = vld [vmem:[#allocation7 + $0xb] ss:$0 sm:$0xff] }
  0x1c   :  { %v272_v31 = vmul.f32 %v494_v28, %v144_v9  ;;  %v490_v38 = vld [vmem:[#allocation5 + $0x1] ss:$0 sm:$0xff]  ;;  %v509_v40 = vld [vmem:[#allocation7 + $0x1] ss:$0 sm:$0xff]  ;;  %v485_v46 = vld [vmem:[#allocation5 + $0x4] ss:$0 sm:$0xff] }
  0x1d   :  { %159 = vrot.lane.b32.xlu2 %v138_v3, %s669_s2  ;;  %v262_v42 = vmul.f32 %v490_v38, %v726_v5  ;;  %v511_v44 = vld [vmem:[#allocation8 + $0x1] ss:$0 sm:$0xff]  ;;  %v501_v47 = vld [vmem:[#allocation7 + $0x4] ss:$0 sm:$0xff]  ;;  %v265_v53 = vmul.f32 %v485_v46, %v712_v0  ;;  %v514_v55 = vld [vmem:[#allocation8 + $0x4] ss:$0 sm:$0xff] }
  0x1e   :  { %155 = vrot.lane.b32.xlu1 %v724_v4, %s669_s2  ;;  %151 = vrot.lane.b32.xlu0 %v726_v5, %s669_s2  ;;  %v492_v57 = vld [vmem:[#allocation5 + $0x7] ss:$0 sm:$0xff]  ;;  %v510_v59 = vld [vmem:[#allocation7 + $0x7] ss:$0 sm:$0xff]  ;;  %v495_v17 = vld [vmem:[#allocation5 + $0xa] ss:$0 sm:$0xff] }
  0x1f   :  { %v516_v38 = vld [vmem:[#allocation7 + $0xd] ss:$0 sm:$0xff]  ;;  %s671_s11 = smov [#allocation10]   ;;  %s459_s15 = sshll.u32 %s833_s4, 4  ;;  %s460_s15 = int_to_ptr.hbm [resolvable:$true] %s459_s15 }
  0x20   :  { %s457_s12 = sshll.u32 %s671_s11, 4  ;;  %s458_s12 = int_to_ptr.vmem [resolvable:$true] %s457_s12 }
  0x25   :  { %165 = vrot.lane.b32.xlu2 %v141_v6, %s669_s2 }
  0x26   :  { %163 = vrot.lane.b32.xlu1 %v733_v7, %s669_s2  ;;  %161 = vrot.lane.b32.xlu0 %v735_v8, %s669_s2 }
  0x2d   :  { %171 = vrot.lane.b32.xlu2 %v144_v9, %s669_s2 }
  0x2e   :  { %169 = vrot.lane.b32.xlu1 %v742_v10, %s669_s2  ;;  %167 = vrot.lane.b32.xlu0 %v744_v11, %s669_s2 }
  0x35   :  { %177 = vrot.lane.b32.xlu2 %v751_v12, %s669_s2 }
  0x36   :  { %175 = vrot.lane.b32.xlu1 %v753_v13, %s669_s2  ;;  %173 = vrot.lane.b32.xlu0 %v755_v14, %s669_s2 }
  0x3d   :  { %183 = vrot.lane.b32.xlu2 %v726_v5, %s670_s3 }
  0x3e   :  { %181 = vrot.lane.b32.xlu1 %v720_v2, %s670_s3  ;;  %179 = vrot.lane.b32.xlu0 %v763_v15, %s669_s2 }
  0x45   :  { %189 = vrot.lane.b32.xlu2 %v712_v0, %s670_s3 }
  0x46   :  { %187 = vrot.lane.b32.xlu1 %v724_v4, %s670_s3  ;;  %185 = vrot.lane.b32.xlu0 %v716_v1, %s670_s3 }
  0x4d   :  { %195 = vrot.lane.b32.xlu2 %v733_v7, %s670_s3 }
  0x4e   :  { %193 = vrot.lane.b32.xlu1 %v735_v8, %s670_s3  ;;  %191 = vrot.lane.b32.xlu0 %v138_v3, %s670_s3  ;;  %v268_v3 = vmul.f32 %v492_v57, %v733_v7  ;;  %v524_v57 = vld [vmem:[#allocation8 + $0x2] ss:$0 sm:$0xff] }
  0x55   :  { %201 = vrot.lane.b32.xlu2 %v742_v10, %s670_s3 }
  0x56   :  { %199 = vrot.lane.b32.xlu1 %v744_v11, %s670_s3  ;;  %197 = vrot.lane.b32.xlu0 %v141_v6, %s670_s3  ;;  %v517_v6 = vld [vmem:[#allocation8 + $0x7] ss:$0 sm:$0xff] }
  0x5d   :  { %207 = vrot.lane.b32.xlu2 %v753_v13, %s670_s3 }
  0x5e   :  { %205 = vrot.lane.b32.xlu1 %v755_v14, %s670_s3  ;;  %203 = vrot.lane.b32.xlu0 %v144_v9, %s670_s3 }
  0x66   :  { %211 = vrot.lane.b32.xlu1 %v763_v15, %s670_s3  ;;  %209 = vrot.lane.b32.xlu0 %v751_v12, %s670_s3 }
  0x6f   :  { %v158_v16 = vpop.permute.xlu2 %157 }
  0x70   :  { %v329_v54 = vmul.f32 %v501_v47, %v158_v16  ;;  %v513_v16 = vld [vmem:[#allocation7 + $0xa] ss:$0 sm:$0xff]  ;;  %v505_v47 = vld [vmem:[#allocation7 + $0x2] ss:$0 sm:$0xff] }
  0x72   :  { %v345_v58 = vadd.f32 %v329_v54, %v265_v53  ;;  %v523_v54 = vld [vmem:[#allocation8 + $0x3] ss:$0 sm:$0xff] }
  0x77   :  { %v160_v20 = vpop.permute.xlu2 %159 }
  0x78   :  { %v330_v21 = vmul.f32 %v502_v18, %v160_v20  ;;  %v487_v20 = vld [vmem:[#allocation5] ss:$0 sm:$0xff] }
  0x79   :  { %v261_v7 = vmul.f32 %v487_v20, %v720_v2  ;;  %v496_v20 = vld [vmem:[#allocation5 + $0x9] ss:$0 sm:$0xff] }
  0x7a   :  { %v780_v23 = vadd.f32 %v330_v21, %v266_v19  ;;  %v506_v21 = vld [vmem:[#allocation7] ss:$0 sm:$0xff] }
  0x7f   :  { %v166_v26 = vpop.permute.xlu2 %165 }
  0x80   :  { %v333_v27 = vmul.f32 %v503_v24, %v166_v26 }
  0x82   :  { %v782_v29 = vadd.f32 %v333_v27, %v269_v25  ;;  %v271_v25 = vmul.f32 %v495_v17, %v742_v10  ;;  %v519_v27 = vld [vmem:[#allocation8 + $0xa] ss:$0 sm:$0xff]  ;;  %v486_v10 = vld [vmem:[#allocation5 + $0x2] ss:$0 sm:$0xff] }
  0x87   :  { %v172_v32 = vpop.permute.xlu2 %171 }
  0x88   :  { %v336_v33 = vmul.f32 %v504_v30, %v172_v32  ;;  %v784_v34 = vpop.permute.xlu1 %153  ;;  %v150_v35 = vpop.permute.xlu0 %149  ;;  %v520_v30 = vld [vmem:[#allocation8] ss:$0 sm:$0xff]  ;;  %v498_v32 = vld [vmem:[#allocation5 + $0xd] ss:$0 sm:$0xff] }
  0x89   :  { %v325_v28 = vmul.f32 %v506_v21, %v150_v35  ;;  %v274_v2 = vmul.f32 %v498_v32, %v753_v13 }
  0x8a   :  { %v786_v36 = vadd.f32 %v336_v33, %v272_v31 }
  0x8f   :  { %v788_v37 = vpop.permute.xlu2 %177 }
  0x90   :  { %v790_v39 = vpop.permute.xlu1 %155  ;;  %v152_v41 = vpop.permute.xlu0 %151 }
  0x91   :  { %v326_v43 = vmul.f32 %v509_v40, %v152_v41 }
  0x93   :  { %v342_v48 = vadd.f32 %v326_v43, %v262_v42  ;;  %v489_v42 = vld [vmem:[#allocation5 + $0x3] ss:$0 sm:$0xff]  ;;  %v341_v43 = vadd.f32 %v325_v28, %v261_v7 }
  0x97   :  { %v184_v45 = vpop.permute.xlu2 %183 }
  0x98   :  { %v164_v49 = vpop.permute.xlu1 %163  ;;  %v406_v50 = vmul.f32 %v511_v44, %v184_v45  ;;  %v793_v51 = vpop.permute.xlu0 %161  ;;  %v508_v44 = vld [vmem:[#allocation7 + $0x3] ss:$0 sm:$0xff] }
  0x99   :  { %v332_v5 = vmul.f32 %v510_v59, %v164_v49  ;;  %v328_v53 = vmul.f32 %v508_v44, %v790_v39 }
  0x9a   :  { %v422_v52 = vadd.f32 %v406_v50, %v342_v48  ;;  %v522_v50 = vld [vmem:[#allocation8 + $0xd] ss:$0 sm:$0xff] }
  0x9b   :  { %v348_v0 = vadd.f32 %v332_v5, %v268_v3  ;;  %v512_v3 = vld [vmem:[#allocation7 + $0x6] ss:$0 sm:$0xff] }
  0x9c   :  { %438 = vst [vmem:[#allocation10 + $0x2] sm:$0x3] %v422_v52  ;;  %v264_v52 = vmul.f32 %v489_v42, %v724_v4 }
  0x9e   :  { %v344_v13 = vadd.f32 %v328_v53, %v264_v52  ;;  %v497_v52 = vld [vmem:[#allocation5 + $0xe] ss:$0 sm:$0xff]  ;;  %v507_v53 = vld [vmem:[#allocation7 + $0xe] ss:$0 sm:$0xff] }
  0x9f   :  { %v190_v56 = vpop.permute.xlu2 %189 }
  0xa0   :  { %v170_v60 = vpop.permute.xlu1 %169  ;;  %v409_v61 = vmul.f32 %v514_v55, %v190_v56  ;;  %v796_v62 = vpop.permute.xlu0 %167  ;;  %v263_v55 = vmul.f32 %v486_v10, %v716_v1  ;;  %v327_v56 = vmul.f32 %v505_v47, %v784_v34  ;;  %v331_v34 = vmul.f32 %v512_v3, %v793_v51  ;;  %v527_v51 = vld [vmem:[#allocation8 + $0x9] ss:$0 sm:$0xff]  ;;  %v530_v10 = vld [vmem:[#allocation8 + $0xb] ss:$0 sm:$0xff] }
  0xa1   :  { %v335_v26 = vmul.f32 %v513_v16, %v170_v60  ;;  %v525_v16 = vld [vmem:[#allocation8 + $0x6] ss:$0 sm:$0xff] }
  0xa2   :  { %v425_v63 = vadd.f32 %v409_v61, %v345_v58 }
  0xa3   :  { %v351_v33 = vadd.f32 %v335_v26, %v271_v25 }
  0xa4   :  { %441 = vst [vmem:[#allocation10 + $0x8] sm:$0x3] %v425_v63  ;;  %v493_v63 = vld [vmem:[#allocation5 + $0x6] ss:$0 sm:$0xff] }
  0xa5   :  { %v267_v1 = vmul.f32 %v493_v63, %v735_v8 }
  0xa7   :  { %v196_v9 = vpop.permute.xlu2 %195  ;;  %v347_v21 = vadd.f32 %v331_v34, %v267_v1 }
  0xa8   :  { %v176_v18 = vpop.permute.xlu1 %175  ;;  %v412_v19 = vmul.f32 %v517_v6, %v196_v9  ;;  %v799_v22 = vpop.permute.xlu0 %173  ;;  %v343_v9 = vadd.f32 %v327_v56, %v263_v55  ;;  %v531_v56 = vld [vmem:[#allocation8 + $0xf] ss:$0 sm:$0xff] }
  0xa9   :  { %v338_v35 = vmul.f32 %v516_v38, %v176_v18  ;;  %v526_v18 = vld [vmem:[#allocation8 + $0x5] ss:$0 sm:$0xff] }
  0xaa   :  { %v428_v24 = vadd.f32 %v412_v19, %v348_v0 }
  0xab   :  { %v354_v59 = vadd.f32 %v338_v35, %v274_v2  ;;  %v521_v2 = vld [vmem:[#allocation7 + $0xf] ss:$0 sm:$0xff] }
  0xac   :  { %444 = vst [vmem:[#allocation10 + $0xe] sm:$0x3] %v428_v24  ;;  %v515_v24 = vld [vmem:[#allocation7 + $0x9] ss:$0 sm:$0xff] }
  0xad   :  { %v334_v8 = vmul.f32 %v515_v24, %v796_v62  ;;  %v529_v62 = vld [vmem:[#allocation8 + $0xc] ss:$0 sm:$0xff] }
  0xaf   :  { %v202_v31 = vpop.permute.xlu2 %201 }
  0xb0   :  { %v415_v40 = vmul.f32 %v519_v27, %v202_v31  ;;  %v182_v41 = vpop.permute.xlu1 %181  ;;  %v803_v46 = vpop.permute.xlu0 %179  ;;  %v528_v31 = vld [vmem:[#allocation8 + $0x8] ss:$0 sm:$0xff] }
  0xb1   :  { %v405_v45 = vmul.f32 %v520_v30, %v182_v41  ;;  %v270_v30 = vmul.f32 %v496_v20, %v744_v11 }
  0xb2   :  { %v431_v48 = vadd.f32 %v415_v40, %v351_v33  ;;  %v499_v33 = vld [vmem:[#allocation5 + $0xc] ss:$0 sm:$0xff]  ;;  %v518_v40 = vld [vmem:[#allocation7 + $0xc] ss:$0 sm:$0xff] }
  0xb3   :  { %v421_v49 = vadd.f32 %v405_v45, %v341_v43  ;;  %v350_v38 = vadd.f32 %v334_v8, %v270_v30  ;;  %v337_v11 = vmul.f32 %v518_v40, %v799_v22  ;;  %v340_v22 = vmul.f32 %v521_v2, %v803_v46 }
  0xb4   :  { %447 = vst [vmem:[#allocation10 + $0x14] sm:$0x3] %v431_v48  ;;  %v500_v48 = vld [vmem:[#allocation5 + $0xf] ss:$0 sm:$0xff] }
  0xb5   :  { %437 = vst [vmem:[#allocation10] sm:$0x3] %v421_v49 }
  0xb7   :  { %v208_v58 = vpop.permute.xlu2 %207 }
  0xb8   :  { %v418_v60 = vmul.f32 %v522_v50, %v208_v58  ;;  %v188_v61 = vpop.permute.xlu1 %187  ;;  %v186_v6 = vpop.permute.xlu0 %185  ;;  %v339_v58 = vmul.f32 %v507_v53, %v788_v37 }
  0xb9   :  { %v408_v5 = vmul.f32 %v523_v54, %v188_v61  ;;  %v407_v17 = vmul.f32 %v524_v57, %v186_v6  ;;  %v275_v57 = vmul.f32 %v497_v52, %v751_v12 }
  0xba   :  { %v434_v4 = vadd.f32 %v418_v60, %v354_v59  ;;  %v532_v59 = vld [vmem:[#allocation8 + $0xe] ss:$0 sm:$0xff] }
  0xbb   :  { %v424_v39 = vadd.f32 %v408_v5, %v344_v13  ;;  %v423_v0 = vadd.f32 %v407_v17, %v343_v9 }
  0xbc   :  { %450 = vst [vmem:[#allocation10 + $0x1a] sm:$0x3] %v434_v4 }
  0xbd   :  { %440 = vst [vmem:[#allocation10 + $0x6] sm:$0x3] %v424_v39 }
  0xbe   :  { %439 = vst [vmem:[#allocation10 + $0x4] sm:$0x3] %v423_v0 }
  0xc0   :  { %v194_v19 = vpop.permute.xlu1 %193  ;;  %v192_v26 = vpop.permute.xlu0 %191 }
  0xc1   :  { %v411_v25 = vmul.f32 %v525_v16, %v194_v19  ;;  %v410_v27 = vmul.f32 %v526_v18, %v192_v26 }
  0xc3   :  { %v427_v7 = vadd.f32 %v411_v25, %v347_v21  ;;  %v426_v28 = vadd.f32 %v410_v27, %v780_v23  ;;  %v273_v23 = vmul.f32 %v499_v33, %v755_v14  ;;  %v276_v14 = vmul.f32 %v500_v48, %v763_v15 }
  0xc4   :  { %v355_v15 = vadd.f32 %v339_v58, %v275_v57 }
  0xc5   :  { %443 = vst [vmem:[#allocation10 + $0xc] sm:$0x3] %v427_v7  ;;  %v353_v49 = vadd.f32 %v337_v11, %v273_v23  ;;  %v356_v61 = vadd.f32 %v340_v22, %v276_v14 }
  0xc6   :  { %442 = vst [vmem:[#allocation10 + $0xa] sm:$0x3] %v426_v28 }
  0xc8   :  { %v200_v32 = vpop.permute.xlu1 %199  ;;  %v198_v42 = vpop.permute.xlu0 %197 }
  0xc9   :  { %v414_v41 = vmul.f32 %v527_v51, %v200_v32  ;;  %v413_v43 = vmul.f32 %v528_v31, %v198_v42 }
  0xcb   :  { %v430_v44 = vadd.f32 %v414_v41, %v350_v38  ;;  %v429_v45 = vadd.f32 %v413_v43, %v782_v29 }
  0xcd   :  { %446 = vst [vmem:[#allocation10 + $0x12] sm:$0x3] %v430_v44 }
  0xce   :  { %445 = vst [vmem:[#allocation10 + $0x10] sm:$0x3] %v429_v45 }
  0xd0   :  { %v206_v47 = vpop.permute.xlu1 %205  ;;  %v204_v50 = vpop.permute.xlu0 %203 }
  0xd1   :  { %v417_v35 = vmul.f32 %v529_v62, %v206_v47  ;;  %v416_v54 = vmul.f32 %v530_v10, %v204_v50 }
  0xd3   :  { %v433_v55 = vadd.f32 %v417_v35, %v353_v49  ;;  %v432_v29 = vadd.f32 %v416_v54, %v786_v36 }
  0xd5   :  { %449 = vst [vmem:[#allocation10 + $0x18] sm:$0x3] %v433_v55 }
  0xd6   :  { %448 = vst [vmem:[#allocation10 + $0x16] sm:$0x3] %v432_v29 }
  0xd8   :  { %v212_v60 = vpop.permute.xlu1 %211  ;;  %v210_v13 = vpop.permute.xlu0 %209 }
  0xd9   :  { %v420_v63 = vmul.f32 %v531_v56, %v212_v60  ;;  %v419_v36 = vmul.f32 %v532_v59, %v210_v13 }
  0xdb   :  { %v436_v46 = vadd.f32 %v420_v63, %v356_v61  ;;  %v435_v3 = vadd.f32 %v419_v36, %v355_v15 }
  0xdd   :  { %452 = vst [vmem:[#allocation10 + $0x1e] sm:$0x3] %v436_v46 }
  0xde   :  { %451 = vst [vmem:[#allocation10 + $0x1c] sm:$0x3] %v435_v3 }
  0xdf   :  { %465 = dma.vmem_to_hbm [thread:$0]  %s458_s12, 512, %s460_s15, [#allocation4], %s665_s27, %s665_s27, %s666_s28  }
  0xe0   :  { %659 = dma.done.wait [#allocation4], 512  }
  0xe1   :  { %660 = vsyncadd [#allocation4], 4294966784 }
  0xe2   :  { %470 = vsyncpa [#allocation3], 1 }
  0xe3   :  { %471 = vsyncpa [#allocation6], 1 }
  0xe4   :  { %472 = vsyncpa [#allocation9], 1 }
  0xe5   :  { %473 = vsyncpa [#allocation4], 1 }

</bundles_post_ra>
